<compile_context>
chip_gen: v6e
topology: v6e:2x2x1
jax: 0.10.0
libtpu: 0.0.40
codegen_flags: <defaults>
</compile_context>

<pallas_src>
import functools

import numpy as np
import jax
import jax.numpy as jnp
from jax.experimental import pallas as pl
from jax.experimental.pallas import tpu as pltpu


def _label_smooth_kernel(pred_ref, sim_ref, w_ref, out_ref, *, inst_per_step):
    """One grid step = `inst_per_step` independent LabelSmoothLoss.forward calls."""
    chunk = pl.program_id(0)
    w_scaled = w_ref[...]                       # (L, L)  W_eff / relation_num, resident

    for i in range(inst_per_step):              # static unroll: tiny per-instance work
        predicts = pred_ref[i]                  # (B, L)
        sims = sim_ref[i]                       # (B, B)

        # getCandidates: candidates = predicts @ (W_eff / relation_num)
        cand = jnp.dot(predicts, w_scaled, preferred_element_type=jnp.float32)   # (B, L)
        # smoothed[b] = similarities[b] @ candidates
        smoothed = jnp.dot(sims, cand, preferred_element_type=jnp.float32)       # (B, L)

        diff = predicts - smoothed
        norms = jnp.sqrt(jnp.sum(diff * diff, axis=-1, keepdims=True))           # (B, 1)

        # Exact match of the torch `if torch.sum(similarities[i]) == 0: continue`.
        row_sums = jnp.sum(sims, axis=-1, keepdims=True)                         # (B, 1)
        mask = (row_sums != 0.0).astype(jnp.float32)

        total = jnp.sum(norms * mask)
        cnt = jnp.sum(mask)
        # Safe denominator so the unselected branch never computes 0/0.
        loss = jnp.where(cnt == 0.0, 0.0, total / jnp.maximum(cnt, 1.0))
        out_ref[chunk * inst_per_step + i, 0] = loss                              # scalar -> SMEM


def label_smooth_loss_batched(predicts, similarities, w_scaled, *, inst_per_step=None):
    """predicts: (N, B, L), similarities: (N, B, B), w_scaled: (L, L).

    Returns (N,) per-instance losses — one LabelSmoothLoss.forward per instance.
    `inst_per_step` instances are handled per grid step (default: all of them,
    i.e. a single grid step); pass a divisor of N to chunk huge instance batches."""
    N, B, L = predicts.shape
    if inst_per_step is None:
        inst_per_step = N
    assert N % inst_per_step == 0, "inst_per_step must divide N"
    n_steps = N // inst_per_step

    kernel = functools.partial(_label_smooth_kernel, inst_per_step=inst_per_step)
    out = pl.pallas_call(
        kernel,
        out_shape=jax.ShapeDtypeStruct((N, 1), jnp.float32),
        grid=(n_steps,),
        in_specs=[
            pl.BlockSpec((inst_per_step, B, L), lambda c: (c, 0, 0)),
            pl.BlockSpec((inst_per_step, B, B), lambda c: (c, 0, 0)),
            # constant index_map: W tile fetched once, stays resident in VMEM
            pl.BlockSpec((L, L), lambda c: (0, 0)),
        ],
        # Whole (N, 1) loss vector lives in SMEM, resident across grid steps.
        out_specs=pl.BlockSpec(memory_space=pltpu.MemorySpace.SMEM),
        compiler_params=pltpu.CompilerParams(dimension_semantics=("arbitrary",)),
    )(predicts, similarities, w_scaled)
    return out[:, 0]


def label_smooth_loss(predicts, similarities, adj_list):
    """Single-instance path mirroring LabelSmoothLoss.forward(predicts, similarities, adjList)."""
    w_scaled = jnp.asarray(adj_list_to_scaled_dense(adj_list, predicts.shape[1]))
    losses = label_smooth_loss_batched(predicts[None], similarities[None], w_scaled)
    return losses[0]


# ---------------- glue: synthetic adjList + dense folding (host side) ----------------

def build_adj_list(label_dim, key):
    """Deterministic synthetic adjacency structure (dict-of-dicts like torch code)."""
    k1, k2 = jax.random.split(key)
    mask = np.array(jax.random.uniform(k1, (label_dim, label_dim)) < 0.3)
    weights = np.array(jax.random.uniform(k2, (label_dim, label_dim),
                                          minval=0.1, maxval=1.0))
    adj_list = []
    for li in range(label_dim):
        adj_list.append({lj: float(weights[li, lj])
                         for lj in range(label_dim) if mask[li, lj]})
    return adj_list


def adj_list_to_scaled_dense(adj_list, label_dim):
    """Fold getCandidates into a single dense matrix:
       W[li,lj]   = adj[li][lj] if present else (1 if li==lj else 0)
       rel[lj]    = #{li : lj in adj[li] or li == lj}      (always >= 1)
       returns W / rel  so that candidates = predicts @ W_scaled."""
    M = np.zeros((label_dim, label_dim), np.float32)
    A = np.zeros((label_dim, label_dim), np.float32)
    for li, d in enumerate(adj_list):
        for lj, a in d.items():
            M[li, lj] = 1.0
            A[li, lj] = a
    I = np.eye(label_dim, dtype=np.float32)
    W = A * M + I * (1.0 - M)
    rel = np.maximum(M, I).sum(axis=0).astype(np.float32)          # (L,)
    return (W / rel[None, :]).astype(np.float32)


def reference_loss(predicts, similarities, adj_list):
    """Direct numpy transcription of the PyTorch loops (float64)."""
    predicts = np.asarray(predicts, np.float64)
    similarities = np.asarray(similarities, np.float64)
    B, L = predicts.shape
    cand = np.zeros((B, L), np.float64)
    for b in range(B):
        for lj in range(L):
            rn = 0
            for li in range(L):
                if lj in adj_list[li]:
                    cand[b, lj] += predicts[b, li] * adj_list[li][lj]
                    rn += 1
                elif li == lj:
                    cand[b, lj] += predicts[b, li]
                    rn += 1
            cand[b, lj] /= rn
    total, cnt = 0.0, 0
    for i in range(B):
        if similarities[i].sum() == 0:
            continue
        cnt += 1
        total += np.linalg.norm(predicts[i] - similarities[i] @ cand, ord=2)
    return 0.0 if cnt == 0 else total / cnt


if __name__ == "__main__":
    N = 4          # problem instances batched into one pallas_call
    B = 8          # batch_size (matches module-level constant)
    L = 16         # label dimension (small, VOC-like)

    key = jax.random.PRNGKey(0)
    k_pred, k_sim, k_adj = jax.random.split(key, 3)

    predicts = jax.random.uniform(k_pred, (N, B, L), dtype=jnp.float32)
    similarities = jax.random.uniform(k_sim, (N, B, B), dtype=jnp.float32)
    # exercise the "skip if sum == 0" branch on one row of instance 0 ...
    similarities = similarities.at[0, 3].set(0.0)
    # ... and the "cnt == 0 -> return 0" branch on instance 2
    similarities = similarities.at[2].set(0.0)

    adj_list = build_adj_list(L, k_adj)
    w_scaled = jnp.asarray(adj_list_to_scaled_dense(adj_list, L))

    refs = np.array([reference_loss(np.array(predicts[n]), np.array(similarities[n]), adj_list)
                     for n in range(N)])

    # batched path: all N LabelSmoothLoss.forward calls in ONE grid step
    losses = label_smooth_loss_batched(predicts, similarities, w_scaled)
    losses = jax.block_until_ready(losses)
    np.testing.assert_allclose(np.array(losses), refs, rtol=1e-4, atol=1e-5)

    # chunked path: same kernel, 2 instances per grid step (W stays resident)
    losses_chunked = label_smooth_loss_batched(predicts, similarities, w_scaled,
                                               inst_per_step=2)
    losses_chunked = jax.block_until_ready(losses_chunked)
    np.testing.assert_allclose(np.array(losses_chunked), refs, rtol=1e-4, atol=1e-5)

    # single-instance path (mirrors the module's forward signature)
    single = label_smooth_loss(predicts[0], similarities[0], adj_list)
    single = jax.block_until_ready(single)
    np.testing.assert_allclose(float(single), refs[0], rtol=1e-4, atol=1e-5)

    print("KERNEL_OK")
</pallas_src>

<mosaic_0001>
module attributes {stable_mosaic.version = 11 : i64} {
  func.func @_label_smooth_kernel(%arg0: i32, %arg1: memref<4x8x16xf32, #tpu.memory_space<vmem>>, %arg2: memref<4x8x8xf32, #tpu.memory_space<vmem>>, %arg3: memref<16x16xf32, #tpu.memory_space<vmem>>, %arg4: memref<4x1xf32, #tpu.memory_space<smem>>) attributes {dimension_semantics = [#tpu.dimension_semantics<arbitrary>], iteration_bounds = array<i64: 1>, scalar_prefetch = 0 : i64, scratch_operands = 0 : i64, tpu.core_type = #tpu.core_type<tc>, window_params = [{transform_indices = @transform_0, window_bounds = array<i64: 4, 8, 16>}, {transform_indices = @transform_1, window_bounds = array<i64: 4, 8, 8>}, {pipeline_mode = #tpu.pipeline_mode<synchronous>, transform_indices = @transform_2, window_bounds = array<i64: 16, 16>}, {transform_indices = @transform_3, window_bounds = array<i64: 4, 1>}]} {
    %c0 = arith.constant 0 : index
    %c0_0 = arith.constant 0 : index
    %0 = vector.load %arg3[%c0, %c0_0] : memref<16x16xf32, #tpu.memory_space<vmem>>, vector<16x16xf32>
    %c0_1 = arith.constant 0 : index
    %c0_2 = arith.constant 0 : index
    %c0_3 = arith.constant 0 : index
    %1 = vector.load %arg1[%c0_1, %c0_2, %c0_3] : memref<4x8x16xf32, #tpu.memory_space<vmem>>, vector<1x8x16xf32>
    %2 = vector.shape_cast %1 : vector<1x8x16xf32> to vector<8x16xf32>
    %c0_4 = arith.constant 0 : index
    %c0_5 = arith.constant 0 : index
    %c0_6 = arith.constant 0 : index
    %3 = vector.load %arg2[%c0_4, %c0_5, %c0_6] : memref<4x8x8xf32, #tpu.memory_space<vmem>>, vector<1x8x8xf32>
    %4 = vector.shape_cast %3 : vector<1x8x8xf32> to vector<8x8xf32>
    %cst = arith.constant dense<0.000000e+00> : vector<8x16xf32>
    %5 = tpu.matmul %2, %0, %cst {dimension_numbers = #tpu.dot_dimension_numbers<[1], [0], [0], [1], [0, 0, 1, 1], [], []>} : vector<8x16xf32>, vector<16x16xf32>, vector<8x16xf32> -> vector<8x16xf32>
    %cst_7 = arith.constant dense<0.000000e+00> : vector<8x16xf32>
    %6 = tpu.matmul %4, %5, %cst_7 {dimension_numbers = #tpu.dot_dimension_numbers<[1], [0], [0], [1], [0, 0, 1, 1], [], []>} : vector<8x8xf32>, vector<8x16xf32>, vector<8x16xf32> -> vector<8x16xf32>
    %7 = arith.subf %2, %6 : vector<8x16xf32>
    %8 = arith.mulf %7, %7 : vector<8x16xf32>
    %cst_8 = arith.constant dense<0.000000e+00> : vector<8xf32>
    %9 = vector.multi_reduction <add>, %8, %cst_8 [1] : vector<8x16xf32> to vector<8xf32>
    %10 = vector.shape_cast %9 : vector<8xf32> to vector<8x1xf32>
    %11 = math.sqrt %10 : vector<8x1xf32>
    %cst_9 = arith.constant dense<0.000000e+00> : vector<8xf32>
    %12 = vector.multi_reduction <add>, %4, %cst_9 [1] : vector<8x8xf32> to vector<8xf32>
    %13 = vector.shape_cast %12 : vector<8xf32> to vector<8x1xf32>
    %cst_10 = arith.constant 0.000000e+00 : f32
    %14 = vector.broadcast %cst_10 : f32 to vector<8x1xf32>
    %15 = arith.cmpf one, %13, %14 : vector<8x1xf32>
    %16 = arith.extui %15 : vector<8x1xi1> to vector<8x1xi32>
    %17 = arith.sitofp %16 : vector<8x1xi32> to vector<8x1xf32>
    %18 = arith.mulf %11, %17 : vector<8x1xf32>
    %19 = vector.shape_cast %18 : vector<8x1xf32> to vector<1x8x1xf32>
    %cst_11 = arith.constant dense<0.000000e+00> : vector<1xf32>
    %20 = vector.multi_reduction <add>, %19, %cst_11 [1, 2] : vector<1x8x1xf32> to vector<1xf32>
    %21 = vector.shape_cast %20 : vector<1xf32> to vector<1x1x1xf32>
    %22 = vector.extract %21[0, 0, 0] : f32 from vector<1x1x1xf32>
    %23 = vector.shape_cast %17 : vector<8x1xf32> to vector<1x8x1xf32>
    %cst_12 = arith.constant dense<0.000000e+00> : vector<1xf32>
    %24 = vector.multi_reduction <add>, %23, %cst_12 [1, 2] : vector<1x8x1xf32> to vector<1xf32>
    %25 = vector.shape_cast %24 : vector<1xf32> to vector<1x1x1xf32>
    %26 = vector.extract %25[0, 0, 0] : f32 from vector<1x1x1xf32>
    %cst_13 = arith.constant 0.000000e+00 : f32
    %27 = arith.cmpf oeq, %26, %cst_13 : f32
    %cst_14 = arith.constant 1.000000e+00 : f32
    %28 = arith.maximumf %26, %cst_14 : f32
    %29 = arith.divf %22, %28 : f32
    %cst_15 = arith.constant 0.000000e+00 : f32
    %30 = arith.select %27, %cst_15, %29 : f32
    %c4_i32 = arith.constant 4 : i32
    %31 = arith.muli %arg0, %c4_i32 : i32
    %c0_i32 = arith.constant 0 : i32
    %32 = arith.addi %31, %c0_i32 : i32
    %33 = arith.index_cast %32 : i32 to index
    %c0_16 = arith.constant 0 : index
    %34 = memref.load %arg4[%33, %c0_16] : memref<4x1xf32, #tpu.memory_space<smem>>
    memref.store %30, %arg4[%33, %c0_16] : memref<4x1xf32, #tpu.memory_space<smem>>
    %c1 = arith.constant 1 : index
    %c0_17 = arith.constant 0 : index
    %c0_18 = arith.constant 0 : index
    %35 = vector.load %arg1[%c1, %c0_17, %c0_18] : memref<4x8x16xf32, #tpu.memory_space<vmem>>, vector<1x8x16xf32>
    %36 = vector.shape_cast %35 : vector<1x8x16xf32> to vector<8x16xf32>
    %c1_19 = arith.constant 1 : index
    %c0_20 = arith.constant 0 : index
    %c0_21 = arith.constant 0 : index
    %37 = vector.load %arg2[%c1_19, %c0_20, %c0_21] : memref<4x8x8xf32, #tpu.memory_space<vmem>>, vector<1x8x8xf32>
    %38 = vector.shape_cast %37 : vector<1x8x8xf32> to vector<8x8xf32>
    %cst_22 = arith.constant dense<0.000000e+00> : vector<8x16xf32>
    %39 = tpu.matmul %36, %0, %cst_22 {dimension_numbers = #tpu.dot_dimension_numbers<[1], [0], [0], [1], [0, 0, 1, 1], [], []>} : vector<8x16xf32>, vector<16x16xf32>, vector<8x16xf32> -> vector<8x16xf32>
    %cst_23 = arith.constant dense<0.000000e+00> : vector<8x16xf32>
    %40 = tpu.matmul %38, %39, %cst_23 {dimension_numbers = #tpu.dot_dimension_numbers<[1], [0], [0], [1], [0, 0, 1, 1], [], []>} : vector<8x8xf32>, vector<8x16xf32>, vector<8x16xf32> -> vector<8x16xf32>
    %41 = arith.subf %36, %40 : vector<8x16xf32>
    %42 = arith.mulf %41, %41 : vector<8x16xf32>
    %cst_24 = arith.constant dense<0.000000e+00> : vector<8xf32>
    %43 = vector.multi_reduction <add>, %42, %cst_24 [1] : vector<8x16xf32> to vector<8xf32>
    %44 = vector.shape_cast %43 : vector<8xf32> to vector<8x1xf32>
    %45 = math.sqrt %44 : vector<8x1xf32>
    %cst_25 = arith.constant dense<0.000000e+00> : vector<8xf32>
    %46 = vector.multi_reduction <add>, %38, %cst_25 [1] : vector<8x8xf32> to vector<8xf32>
    %47 = vector.shape_cast %46 : vector<8xf32> to vector<8x1xf32>
    %cst_26 = arith.constant 0.000000e+00 : f32
    %48 = vector.broadcast %cst_26 : f32 to vector<8x1xf32>
    %49 = arith.cmpf one, %47, %48 : vector<8x1xf32>
    %50 = arith.extui %49 : vector<8x1xi1> to vector<8x1xi32>
    %51 = arith.sitofp %50 : vector<8x1xi32> to vector<8x1xf32>
    %52 = arith.mulf %45, %51 : vector<8x1xf32>
    %53 = vector.shape_cast %52 : vector<8x1xf32> to vector<1x8x1xf32>
    %cst_27 = arith.constant dense<0.000000e+00> : vector<1xf32>
    %54 = vector.multi_reduction <add>, %53, %cst_27 [1, 2] : vector<1x8x1xf32> to vector<1xf32>
    %55 = vector.shape_cast %54 : vector<1xf32> to vector<1x1x1xf32>
    %56 = vector.extract %55[0, 0, 0] : f32 from vector<1x1x1xf32>
    %57 = vector.shape_cast %51 : vector<8x1xf32> to vector<1x8x1xf32>
    %cst_28 = arith.constant dense<0.000000e+00> : vector<1xf32>
    %58 = vector.multi_reduction <add>, %57, %cst_28 [1, 2] : vector<1x8x1xf32> to vector<1xf32>
    %59 = vector.shape_cast %58 : vector<1xf32> to vector<1x1x1xf32>
    %60 = vector.extract %59[0, 0, 0] : f32 from vector<1x1x1xf32>
    %cst_29 = arith.constant 0.000000e+00 : f32
    %61 = arith.cmpf oeq, %60, %cst_29 : f32
    %cst_30 = arith.constant 1.000000e+00 : f32
    %62 = arith.maximumf %60, %cst_30 : f32
    %63 = arith.divf %56, %62 : f32
    %cst_31 = arith.constant 0.000000e+00 : f32
    %64 = arith.select %61, %cst_31, %63 : f32
    %c4_i32_32 = arith.constant 4 : i32
    %65 = arith.muli %arg0, %c4_i32_32 : i32
    %c1_i32 = arith.constant 1 : i32
    %66 = arith.addi %65, %c1_i32 : i32
    %67 = arith.index_cast %66 : i32 to index
    %c0_33 = arith.constant 0 : index
    %68 = memref.load %arg4[%67, %c0_33] : memref<4x1xf32, #tpu.memory_space<smem>>
    memref.store %64, %arg4[%67, %c0_33] : memref<4x1xf32, #tpu.memory_space<smem>>
    %c2 = arith.constant 2 : index
    %c0_34 = arith.constant 0 : index
    %c0_35 = arith.constant 0 : index
    %69 = vector.load %arg1[%c2, %c0_34, %c0_35] : memref<4x8x16xf32, #tpu.memory_space<vmem>>, vector<1x8x16xf32>
    %70 = vector.shape_cast %69 : vector<1x8x16xf32> to vector<8x16xf32>
    %c2_36 = arith.constant 2 : index
    %c0_37 = arith.constant 0 : index
    %c0_38 = arith.constant 0 : index
    %71 = vector.load %arg2[%c2_36, %c0_37, %c0_38] : memref<4x8x8xf32, #tpu.memory_space<vmem>>, vector<1x8x8xf32>
    %72 = vector.shape_cast %71 : vector<1x8x8xf32> to vector<8x8xf32>
    %cst_39 = arith.constant dense<0.000000e+00> : vector<8x16xf32>
    %73 = tpu.matmul %70, %0, %cst_39 {dimension_numbers = #tpu.dot_dimension_numbers<[1], [0], [0], [1], [0, 0, 1, 1], [], []>} : vector<8x16xf32>, vector<16x16xf32>, vector<8x16xf32> -> vector<8x16xf32>
    %cst_40 = arith.constant dense<0.000000e+00> : vector<8x16xf32>
    %74 = tpu.matmul %72, %73, %cst_40 {dimension_numbers = #tpu.dot_dimension_numbers<[1], [0], [0], [1], [0, 0, 1, 1], [], []>} : vector<8x8xf32>, vector<8x16xf32>, vector<8x16xf32> -> vector<8x16xf32>
    %75 = arith.subf %70, %74 : vector<8x16xf32>
    %76 = arith.mulf %75, %75 : vector<8x16xf32>
    %cst_41 = arith.constant dense<0.000000e+00> : vector<8xf32>
    %77 = vector.multi_reduction <add>, %76, %cst_41 [1] : vector<8x16xf32> to vector<8xf32>
    %78 = vector.shape_cast %77 : vector<8xf32> to vector<8x1xf32>
    %79 = math.sqrt %78 : vector<8x1xf32>
    %cst_42 = arith.constant dense<0.000000e+00> : vector<8xf32>
    %80 = vector.multi_reduction <add>, %72, %cst_42 [1] : vector<8x8xf32> to vector<8xf32>
    %81 = vector.shape_cast %80 : vector<8xf32> to vector<8x1xf32>
    %cst_43 = arith.constant 0.000000e+00 : f32
    %82 = vector.broadcast %cst_43 : f32 to vector<8x1xf32>
    %83 = arith.cmpf one, %81, %82 : vector<8x1xf32>
    %84 = arith.extui %83 : vector<8x1xi1> to vector<8x1xi32>
    %85 = arith.sitofp %84 : vector<8x1xi32> to vector<8x1xf32>
    %86 = arith.mulf %79, %85 : vector<8x1xf32>
    %87 = vector.shape_cast %86 : vector<8x1xf32> to vector<1x8x1xf32>
    %cst_44 = arith.constant dense<0.000000e+00> : vector<1xf32>
    %88 = vector.multi_reduction <add>, %87, %cst_44 [1, 2] : vector<1x8x1xf32> to vector<1xf32>
    %89 = vector.shape_cast %88 : vector<1xf32> to vector<1x1x1xf32>
    %90 = vector.extract %89[0, 0, 0] : f32 from vector<1x1x1xf32>
    %91 = vector.shape_cast %85 : vector<8x1xf32> to vector<1x8x1xf32>
    %cst_45 = arith.constant dense<0.000000e+00> : vector<1xf32>
    %92 = vector.multi_reduction <add>, %91, %cst_45 [1, 2] : vector<1x8x1xf32> to vector<1xf32>
    %93 = vector.shape_cast %92 : vector<1xf32> to vector<1x1x1xf32>
    %94 = vector.extract %93[0, 0, 0] : f32 from vector<1x1x1xf32>
    %cst_46 = arith.constant 0.000000e+00 : f32
    %95 = arith.cmpf oeq, %94, %cst_46 : f32
    %cst_47 = arith.constant 1.000000e+00 : f32
    %96 = arith.maximumf %94, %cst_47 : f32
    %97 = arith.divf %90, %96 : f32
    %cst_48 = arith.constant 0.000000e+00 : f32
    %98 = arith.select %95, %cst_48, %97 : f32
    %c4_i32_49 = arith.constant 4 : i32
    %99 = arith.muli %arg0, %c4_i32_49 : i32
    %c2_i32 = arith.constant 2 : i32
    %100 = arith.addi %99, %c2_i32 : i32
    %101 = arith.index_cast %100 : i32 to index
    %c0_50 = arith.constant 0 : index
    %102 = memref.load %arg4[%101, %c0_50] : memref<4x1xf32, #tpu.memory_space<smem>>
    memref.store %98, %arg4[%101, %c0_50] : memref<4x1xf32, #tpu.memory_space<smem>>
    %c3 = arith.constant 3 : index
    %c0_51 = arith.constant 0 : index
    %c0_52 = arith.constant 0 : index
    %103 = vector.load %arg1[%c3, %c0_51, %c0_52] : memref<4x8x16xf32, #tpu.memory_space<vmem>>, vector<1x8x16xf32>
    %104 = vector.shape_cast %103 : vector<1x8x16xf32> to vector<8x16xf32>
    %c3_53 = arith.constant 3 : index
    %c0_54 = arith.constant 0 : index
    %c0_55 = arith.constant 0 : index
    %105 = vector.load %arg2[%c3_53, %c0_54, %c0_55] : memref<4x8x8xf32, #tpu.memory_space<vmem>>, vector<1x8x8xf32>
    %106 = vector.shape_cast %105 : vector<1x8x8xf32> to vector<8x8xf32>
    %cst_56 = arith.constant dense<0.000000e+00> : vector<8x16xf32>
    %107 = tpu.matmul %104, %0, %cst_56 {dimension_numbers = #tpu.dot_dimension_numbers<[1], [0], [0], [1], [0, 0, 1, 1], [], []>} : vector<8x16xf32>, vector<16x16xf32>, vector<8x16xf32> -> vector<8x16xf32>
    %cst_57 = arith.constant dense<0.000000e+00> : vector<8x16xf32>
    %108 = tpu.matmul %106, %107, %cst_57 {dimension_numbers = #tpu.dot_dimension_numbers<[1], [0], [0], [1], [0, 0, 1, 1], [], []>} : vector<8x8xf32>, vector<8x16xf32>, vector<8x16xf32> -> vector<8x16xf32>
    %109 = arith.subf %104, %108 : vector<8x16xf32>
    %110 = arith.mulf %109, %109 : vector<8x16xf32>
    %cst_58 = arith.constant dense<0.000000e+00> : vector<8xf32>
    %111 = vector.multi_reduction <add>, %110, %cst_58 [1] : vector<8x16xf32> to vector<8xf32>
    %112 = vector.shape_cast %111 : vector<8xf32> to vector<8x1xf32>
    %113 = math.sqrt %112 : vector<8x1xf32>
    %cst_59 = arith.constant dense<0.000000e+00> : vector<8xf32>
    %114 = vector.multi_reduction <add>, %106, %cst_59 [1] : vector<8x8xf32> to vector<8xf32>
    %115 = vector.shape_cast %114 : vector<8xf32> to vector<8x1xf32>
    %cst_60 = arith.constant 0.000000e+00 : f32
    %116 = vector.broadcast %cst_60 : f32 to vector<8x1xf32>
    %117 = arith.cmpf one, %115, %116 : vector<8x1xf32>
    %118 = arith.extui %117 : vector<8x1xi1> to vector<8x1xi32>
    %119 = arith.sitofp %118 : vector<8x1xi32> to vector<8x1xf32>
    %120 = arith.mulf %113, %119 : vector<8x1xf32>
    %121 = vector.shape_cast %120 : vector<8x1xf32> to vector<1x8x1xf32>
    %cst_61 = arith.constant dense<0.000000e+00> : vector<1xf32>
    %122 = vector.multi_reduction <add>, %121, %cst_61 [1, 2] : vector<1x8x1xf32> to vector<1xf32>
    %123 = vector.shape_cast %122 : vector<1xf32> to vector<1x1x1xf32>
    %124 = vector.extract %123[0, 0, 0] : f32 from vector<1x1x1xf32>
    %125 = vector.shape_cast %119 : vector<8x1xf32> to vector<1x8x1xf32>
    %cst_62 = arith.constant dense<0.000000e+00> : vector<1xf32>
    %126 = vector.multi_reduction <add>, %125, %cst_62 [1, 2] : vector<1x8x1xf32> to vector<1xf32>
    %127 = vector.shape_cast %126 : vector<1xf32> to vector<1x1x1xf32>
    %128 = vector.extract %127[0, 0, 0] : f32 from vector<1x1x1xf32>
    %cst_63 = arith.constant 0.000000e+00 : f32
    %129 = arith.cmpf oeq, %128, %cst_63 : f32
    %cst_64 = arith.constant 1.000000e+00 : f32
    %130 = arith.maximumf %128, %cst_64 : f32
    %131 = arith.divf %124, %130 : f32
    %cst_65 = arith.constant 0.000000e+00 : f32
    %132 = arith.select %129, %cst_65, %131 : f32
    %c4_i32_66 = arith.constant 4 : i32
    %133 = arith.muli %arg0, %c4_i32_66 : i32
    %c3_i32 = arith.constant 3 : i32
    %134 = arith.addi %133, %c3_i32 : i32
    %135 = arith.index_cast %134 : i32 to index
    %c0_67 = arith.constant 0 : index
    %136 = memref.load %arg4[%135, %c0_67] : memref<4x1xf32, #tpu.memory_space<smem>>
    memref.store %132, %arg4[%135, %c0_67] : memref<4x1xf32, #tpu.memory_space<smem>>
    return
  }
  func.func @transform_0(%arg0: i32) -> (i32, i32, i32) {
    %c0_i32 = arith.constant 0 : i32
    %c0_i32_0 = arith.constant 0 : i32
    %c0_i32_1 = arith.constant 0 : i32
    return %arg0, %c0_i32, %c0_i32_0 : i32, i32, i32
  }
  func.func @transform_1(%arg0: i32) -> (i32, i32, i32) {
    %c0_i32 = arith.constant 0 : i32
    %c0_i32_0 = arith.constant 0 : i32
    %c0_i32_1 = arith.constant 0 : i32
    return %arg0, %c0_i32, %c0_i32_0 : i32, i32, i32
  }
  func.func @transform_2(%arg0: i32) -> (i32, i32) {
    %c0_i32 = arith.constant 0 : i32
    %c0_i32_0 = arith.constant 0 : i32
    %c0_i32_1 = arith.constant 0 : i32
    return %c0_i32, %c0_i32_0 : i32, i32
  }
  func.func @transform_3(%arg0: i32) -> (i32, i32) {
    %c0_i32 = arith.constant 0 : i32
    %c0_i32_0 = arith.constant 0 : i32
    %c0_i32_1 = arith.constant 0 : i32
    return %c0_i32, %c0_i32_0 : i32, i32
  }
}

</mosaic_0001>

<bundles_post_ra>
// kernel: tpu_custom_call.1
= control target key start
LH: loop header
LB: loop body
LE: loop exit
PB: predicated region body
PF: predicated region fallthrough
CT: control target
= control target key end

     0   :  { %8 = vsyncpa [#allocation3], 0  ;;  %s1191_s0 = inlined_call_operand.hbm [shape: f32[4,8,16], index: 0, kind: input, shape index: {}]   ;;  %s1192_s1 = inlined_call_operand.hbm [shape: f32[4,8,8], index: 1, kind: input, shape index: {}]   ;;  %s1193_s2 = inlined_call_operand.hbm [shape: f32[16,16], index: 2, kind: input, shape index: {}]   ;;  %s1194_s3 = inlined_call_operand.vmem [shape: f32[4,1], index: 3, kind: output, shape index: {}]  }
   0x1   :  { %9 = vsyncpa [#allocation6], 0 }
   0x2   :  { %10 = vsyncpa [#allocation4], 0  ;;  %s1086_s12 = smov [#allocation5]   ;;  %s1087_s14 = smov [#allocation2]  }
   0x3   :  { %s28_s13 = sshll.u32 %s1086_s12, 4  ;;  %s16_s15 = sshll.u32 %s1087_s14, 4  ;;  %s29_s13 = int_to_ptr.vmem [resolvable:$true] %s28_s13  ;;  %s17_s15 = int_to_ptr.vmem [resolvable:$true] %s16_s15 }
   0x4   :  { %s1016_s16 = scalar_lea.vmem %s29_s13, 512  ;;  %p1021_p1 = scmp.lt.s32.totalorder %s29_s13, %s29_s13 }
   0x5   :  { %p1017_p0 = scmp.ne.s32.totalorder %s29_s13, %s1016_s16  ;;  %p1022_p2 = scmp.lt.s32.totalorder %s1016_s16, %s1016_s16 }
   0x7   :  { %p1023_p3 = por %p1022_p2, %p1021_p1 }
   0x9   :  { %p1024_p4 = pnand %p1023_p3, %p1017_p0 }
   0xb   :  { %1027 = shalt.err (!%p1024_p4)
}
   0xc   :  { %s1088_s17 = smov 128   ;;  %s1089_s18 = smov 8  }
   0xd   :  { %34 = dma.hbm_to_vmem [thread:$0]  %s1192_s1, 512, %s29_s13, [#allocation6], %s1088_s17, %s1088_s17, %s1089_s18  }
   0xe   :  { %s1036_s21 = scalar_lea.vmem %s17_s15, 512  ;;  %p1041_p6 = scmp.lt.s32.totalorder %s17_s15, %s17_s15 }
   0xf   :  { %p1037_p5 = scmp.ne.s32.totalorder %s17_s15, %s1036_s21  ;;  %p1042_p7 = scmp.lt.s32.totalorder %s1036_s21, %s1036_s21 }
  0x11   :  { %p1043_p8 = por %p1042_p7, %p1041_p6 }
  0x13   :  { %p1044_p9 = pnand %p1043_p8, %p1037_p5 }
  0x15   :  { %1047 = shalt.err (!%p1044_p9)
}
  0x16   :  { %22 = dma.hbm_to_vmem [thread:$0]  %s1191_s0, 512, %s17_s15, [#allocation3], %s1088_s17, %s1088_s17, %s1089_s18  }
  0x17   :  { %s1090_s24 = smov [#allocation7]  }
  0x18   :  { %s40_s25 = sshll.u32 %s1090_s24, 4  ;;  %s41_s25 = int_to_ptr.vmem [resolvable:$true] %s40_s25 }
  0x19   :  { %s1056_s26 = scalar_lea.vmem %s41_s25, 256  ;;  %p1061_p11 = scmp.lt.s32.totalorder %s41_s25, %s41_s25 }
  0x1a   :  { %p1057_p10 = scmp.ne.s32.totalorder %s41_s25, %s1056_s26  ;;  %p1062_p12 = scmp.lt.s32.totalorder %s1056_s26, %s1056_s26 }
  0x1c   :  { %p1063_p13 = por %p1062_p12, %p1061_p11 }
  0x1e   :  { %p1064_p0 = pnand %p1063_p13, %p1057_p10 }
  0x20   :  { %1067 = shalt.err (!%p1064_p0)
}
  0x21   :  { %46 = dma.hbm_to_vmem [thread:$0]  %s1193_s2, 256, %s41_s25, [#allocation6], %s1088_s17, %s1088_s17, %s1089_s18  }
  0x22   :  { %1080 = dma.done.wait [#allocation3], 512  }
  0x23   :  { %1081 = vsyncadd [#allocation3], 4294966784 }
  0x24   :  { %1082 = dma.done.wait [#allocation6], 768  }
  0x25   :  { %1083 = vsyncadd [#allocation6], 4294966528  ;;  %v1091_v0 = vmov 0.0   ;;  %vm1092_vm0 = vmmov 0   ;;  %v57_v1 = vld [vmem:[#allocation7 + $0x8] sm:$0xff]  ;;  %v56_v2 = vld [vmem:[#allocation7] sm:$0xff] }
  0x26   :  { %911 = vmatprep.subr.mxu0 %v1091_v0  ;;  %915 = vmatprep.mubr.msk.f32.mxu0 %vm1092_vm0, %v1091_v0  ;;  %v58_v3 = vld [vmem:[#allocation2] sm:$0xff]  ;;  %vm60_vm1 = vcmask 130048   ;;  %vm134_vm2 = vcmask 64512   ;;  %v260_v7 = vld [vmem:[#allocation2 + $0x8] sm:$0xff]  ;;  %v460_v8 = vld [vmem:[#allocation2 + $0x10] sm:$0xff]  ;;  %vm227_vm6 = vcmask 7168  }
  0x27   :  { %918 = vmatprep.subr.mxu1 %v1091_v0  ;;  %920 = vmatprep.mubr.msk.f32.mxu1 %vm1092_vm0, %v1091_v0  ;;  %v59_v4 = vld [vmem:[#allocation5] sm:$0xff]  ;;  %v1149_v9 = vld [vmem:[#allocation2 + $0x18] sm:$0xff]  ;;  %v262_v14 = vld [vmem:[#allocation5 + $0x8] sm:$0xff]  ;;  %s1093_s28 = smov 1.0   ;;  %s865_s20 = sshll.u32 %s1194_s3, 4  ;;  %s866_s20 = int_to_ptr.vmem [resolvable:$true] %s865_s20 }
  0x28   :  { %912 = vmatpush3.msra.mxu0 %v57_v1  ;;  %v220_v18 = vsel %vm134_vm2, %v59_v4, 0.0  ;;  %v462_v19 = vld [vmem:[#allocation5 + $0x10] sm:$0xff]  ;;  %v662_v23 = vld [vmem:[#allocation5 + $0x18] sm:$0xff]  ;;  %v421_v43 = vsel %vm134_vm2, %v262_v14, 0.0  ;;  %s1068_s23 = scalar_lea.vmem %s866_s20, 64  ;;  %p1073_p6 = scmp.lt.s32.totalorder %s866_s20, %s866_s20 }
  0x29   :  { %913 = vmatprep.subr.mxu0 %v1091_v0  ;;  %v621_v47 = vsel %vm134_vm2, %v462_v19, 0.0  ;;  %p1069_p5 = scmp.ne.s32.totalorder %s866_s20, %s1068_s23  ;;  %p1074_p7 = scmp.lt.s32.totalorder %s1068_s23, %s1068_s23 }
  0x2a   :  { %914 = vmatpush3.msra.mxu0 %v56_v2 }
  0x2b   :  { %916 = vmatmul.mubr.msk.f32.vlgmr.msra.gmra.mxu0 %vm60_vm1, %v58_v3  ;;  %930 = vmatprep.subr.mxu0 %v1091_v0  ;;  %p1075_p8 = por %p1074_p7, %p1073_p6 }
  0x2c   :  { %932 = vmatprep.mubr.msk.f32.mxu0 %vm1092_vm0, %v1091_v0 }
  0x2d   :  { %p1076_p9 = pnand %p1075_p8, %p1069_p5 }
  0xeb   :  { %v130_v5 = vpop.f32.mrf.mxu0 }
  0xec   :  { %919 = vmatpush3.msra.mxu1 %v130_v5 }
  0xed   :  { %v917_v6 = vpop.f32.mrf.mxu0  ;;  %921 = vmatmul.mubr.msk.f32.vlgmr.msra.gmra.mxu1 %vm134_vm2, %v59_v4  ;;  %923 = vmatprep.subr.mxu1 %v1091_v0 }
  0xee   :  { %924 = vmatpush3.msra.mxu1 %v57_v1  ;;  %927 = vmatprep.mubr.msk.f32.mxu1 %vm1092_vm0, %v1091_v0 }
  0xef   :  { %925 = vmatprep.subr.mxu1 %v1091_v0 }
  0xf0   :  { %926 = vmatpush3.msra.mxu1 %v56_v2 }
  0xf1   :  { %928 = vmatmul.mubr.msk.f32.vlgmr.msra.gmra.mxu1 %vm60_vm1, %v260_v7  ;;  %935 = vmatprep.subr.mxu1 %v1091_v0 }
  0xf2   :  { %936 = vmatpush3.msra.mxu1 %v57_v1  ;;  %939 = vmatprep.mubr.msk.f32.mxu1 %vm1092_vm0, %v1091_v0 }
  0xf3   :  { %937 = vmatprep.subr.mxu1 %v1091_v0 }
  0xf4   :  { %938 = vmatpush3.msra.mxu1 %v56_v2 }
  0xf5   :  { %940 = vmatmul.mubr.msk.f32.vlgmr.msra.gmra.mxu1 %vm60_vm1, %v460_v8  ;;  %947 = vmatprep.subr.mxu1 %v1091_v0 }
  0xf6   :  { %948 = vmatpush3.msra.mxu1 %v57_v1  ;;  %951 = vmatprep.mubr.msk.f32.mxu1 %vm1092_vm0, %v1091_v0  ;;  %v821_v1 = vsel %vm134_vm2, %v662_v23, 0.0 }
  0xf7   :  { %949 = vmatprep.subr.mxu1 %v1091_v0 }
  0xf8   :  { %950 = vmatpush3.msra.mxu1 %v56_v2 }
  0xf9   :  { %952 = vmatmul.mubr.msk.f32.vlgmr.msra.gmra.mxu1 %vm60_vm1, %v1149_v9 }
 0x1ad   :  { %v204_v10 = vpop.f32.mrf.mxu1 }
 0x1ae   :  { %v208_v11 = vsub.f32 %v58_v3, %v204_v10 }
 0x1af   :  { %v922_v12 = vpop.f32.mrf.mxu1 }
 0x1b0   :  { %v209_v13 = vmul.f32 %v208_v11, %v208_v11 }
 0x1b1   :  { %v332_v15 = vpop.f32.mrf.mxu1 }
 0x1b2   :  { %931 = vmatpush3.msra.mxu0 %v332_v15  ;;  %v210_v16 = vsel %vm60_vm1, %v209_v13, 0.0 }
 0x1b3   :  { %211 = vadd.xlane.f32.xlu0 %v210_v16  ;;  %v929_v17 = vpop.f32.mrf.mxu1  ;;  %933 = vmatmul.mubr.msk.f32.vlgmr.msra.gmra.mxu0 %vm134_vm2, %v262_v14 }
 0x1b4   :  { %942 = vmatprep.subr.mxu0 %v1091_v0  ;;  %944 = vmatprep.mubr.msk.f32.mxu0 %vm1092_vm0, %v1091_v0 }
 0x1b5   :  { %v532_v20 = vpop.f32.mrf.mxu1 }
 0x1b6   :  { %943 = vmatpush3.msra.mxu0 %v532_v20 }
 0x1b7   :  { %221 = vadd.xlane.f32.xlu0 %v220_v18  ;;  %945 = vmatmul.mubr.msk.f32.vlgmr.msra.gmra.mxu0 %vm134_vm2, %v462_v19  ;;  %v941_v21 = vpop.f32.mrf.mxu1 }
 0x1b8   :  { %954 = vmatprep.subr.mxu0 %v1091_v0  ;;  %956 = vmatprep.mubr.msk.f32.mxu0 %vm1092_vm0, %v1091_v0 }
 0x1b9   :  { %v732_v22 = vpop.f32.mrf.mxu1 }
 0x1ba   :  { %955 = vmatpush3.msra.mxu0 %v732_v22 }
 0x1bb   :  { %v953_v24 = vpop.f32.mrf.mxu1  ;;  %957 = vmatmul.mubr.msk.f32.vlgmr.msra.gmra.mxu0 %vm134_vm2, %v662_v23 }
 0x23c   :  { %v212_v25 = vpop.xlane.xlu0 %211 }
 0x23d   :  { %992 = vrsqrt.f32 %v212_v25  ;;  %vm215_vm4 = vcmp.eq.f32.partialorder %v212_v25, inf  ;;  %v218_v30 = vand.u32 2147483648, %v212_v25  ;;  %vm217_vm5 = vcmp.eq.f32.partialorder %v212_v25, 0.0 }
 0x240   :  { %v222_v26 = vpop.xlane.xlu0 %221 }
 0x241   :  { %vm223_vm3 = vcmp.ne.f32.partialorder %v222_v26, 0.0 }
 0x242   :  { %v881_v29 = vsel %vm223_vm3, 1.0, %v1091_v0 }
 0x243   :  { %v238_v46 = vsel %vm227_vm6, %v881_v29, 0.0 }
 0x24a   :  { %v993_v27 = vpop.eup %992 }
 0x24b   :  { %v214_v28 = vmul.f32 %v993_v27, %v212_v25 }
 0x24d   :  { %v216_v31 = vsel %vm215_vm4, %v212_v25, %v214_v28 }
 0x24e   :  { %v219_v32 = vsel %vm217_vm5, %v218_v30, %v216_v31 }
 0x24f   :  { %v226_v33 = vmul.f32 %v881_v29, %v219_v32 }
 0x251   :  { %v228_v34 = vsel %vm227_vm6, %v226_v33, 0.0 }
 0x252   :  { %229 = vadd.xlane.f32.xlu0 %v228_v34 }
 0x273   :  { %v405_v35 = vpop.f32.mrf.mxu0 }
 0x274   :  { %v409_v36 = vsub.f32 %v260_v7, %v405_v35 }
 0x275   :  { %v934_v37 = vpop.f32.mrf.mxu0 }
 0x276   :  { %v410_v38 = vmul.f32 %v409_v36, %v409_v36 }
 0x277   :  { %v605_v39 = vpop.f32.mrf.mxu0 }
 0x278   :  { %v411_v40 = vsel %vm60_vm1, %v410_v38, 0.0  ;;  %v609_v41 = vsub.f32 %v460_v8, %v605_v39 }
 0x279   :  { %412 = vadd.xlane.f32.xlu1 %v411_v40  ;;  %v946_v42 = vpop.f32.mrf.mxu0 }
 0x27a   :  { %v610_v44 = vmul.f32 %v609_v41, %v609_v41 }
 0x27b   :  { %v805_v48 = vpop.f32.mrf.mxu0 }
 0x27c   :  { %v611_v45 = vsel %vm60_vm1, %v610_v44, 0.0  ;;  %v809_v6 = vsub.f32 %v1149_v9, %v805_v48 }
 0x27d   :  { %422 = vadd.xlane.f32.xlu1 %v421_v43  ;;  %612 = vadd.xlane.f32.xlu0 %v611_v45  ;;  %v958_v49 = vpop.f32.mrf.mxu0 }
 0x27e   :  { %v810_v16 = vmul.f32 %v809_v6, %v809_v6 }
 0x280   :  { %v811_v24 = vsel %vm60_vm1, %v810_v16, 0.0 }
 0x281   :  { %239 = vadd.xlane.f32.xlu1 %v238_v46 }
 0x285   :  { %622 = vadd.xlane.f32.xlu1 %v621_v47 }
 0x2db   :  { %v230_v50 = vpop.xlane.xlu0 %229 }
 0x2dc   :  { %v231_v51 = vrot.slane %v230_v50, 4 }
 0x2de   :  { %v232_v52 = vadd.f32 %v231_v51, %v230_v50 }
 0x2e0   :  { %v233_v53 = vrot.slane %v232_v52, 2 }
 0x2e2   :  { %v234_v54 = vadd.f32 %v233_v53, %v232_v52 }
 0x2e4   :  { %v235_v55 = vrot.slane %v234_v54, 1 }
 0x2e6   :  { %v236_v56 = vadd.f32 %v235_v55, %v234_v54 }
 0x2e8   :  { %959 = vpush %v236_v56 }
 0x302   :  { %v413_v57 = vpop.xlane.xlu1 %412 }
 0x303   :  { %994 = vrsqrt.f32 %v413_v57  ;;  %vm416_vm9 = vcmp.eq.f32.partialorder %v413_v57, inf  ;;  %v419_v12 = vand.u32 2147483648, %v413_v57  ;;  %vm418_vm10 = vcmp.eq.f32.partialorder %v413_v57, 0.0 }
 0x306   :  { %v423_v58 = vpop.xlane.xlu1 %422  ;;  %v613_v59 = vpop.xlane.xlu0 %612 }
 0x307   :  { %vm424_vm7 = vcmp.ne.f32.partialorder %v423_v58, 0.0  ;;  %996 = vrsqrt.f32 %v613_v59  ;;  %vm616_vm11 = vcmp.eq.f32.partialorder %v613_v59, inf  ;;  %v619_v18 = vand.u32 2147483648, %v613_v59 }
 0x308   :  { %v884_v60 = vsel %vm424_vm7, 1.0, %v1091_v0  ;;  %vm618_vm12 = vcmp.eq.f32.partialorder %v613_v59, 0.0 }
 0x309   :  { %v438_v61 = vsel %vm227_vm6, %v884_v60, 0.0 }
 0x30a   :  { %v240_v62 = vpop.xlane.xlu1 %239  ;;  %439 = vadd.xlane.f32.xlu1 %v438_v61 }
 0x30b   :  { %v241_v63 = vrot.slane %v240_v62, 4 }
 0x30d   :  { %v242_v2 = vadd.f32 %v241_v63, %v240_v62 }
 0x30e   :  { %822 = vadd.xlane.f32.xlu1 %v821_v1  ;;  %v623_v3 = vpop.xlane.xlu1 %622 }
 0x30f   :  { %v243_v4 = vrot.slane %v242_v2, 2  ;;  %vm624_vm8 = vcmp.ne.f32.partialorder %v623_v3, 0.0 }
 0x310   :  { %v995_v5 = vpop.eup %994  ;;  %v887_v7 = vsel %vm624_vm8, 1.0, %v1091_v0 }
 0x311   :  { %v244_v8 = vadd.f32 %v243_v4, %v242_v2  ;;  %v415_v10 = vmul.f32 %v995_v5, %v413_v57  ;;  %v638_v11 = vsel %vm227_vm6, %v887_v7, 0.0 }
 0x312   :  { %639 = vadd.xlane.f32.xlu1 %v638_v11 }
 0x313   :  { %v245_v13 = vrot.slane %v244_v8, 1  ;;  %v417_v14 = vsel %vm416_vm9, %v413_v57, %v415_v10 }
 0x314   :  { %v997_v15 = vpop.eup %996  ;;  %v420_v17 = vsel %vm418_vm10, %v419_v12, %v417_v14 }
 0x315   :  { %v246_v19 = vadd.f32 %v245_v13, %v244_v8  ;;  %v427_v20 = vmul.f32 %v884_v60, %v420_v17  ;;  %v615_v9 = vmul.f32 %v997_v15, %v613_v59 }
 0x317   :  { %961 = vpush %v246_v19  ;;  %v428_v21 = vsel %vm227_vm6, %v427_v20, 0.0  ;;  %v617_v22 = vsel %vm616_vm11, %v613_v59, %v615_v9 }
 0x318   :  { %429 = vadd.xlane.f32.xlu0 %v428_v21  ;;  %v620_v23 = vsel %vm618_vm12, %v619_v18, %v617_v22 }
 0x319   :  { %v627_v25 = vmul.f32 %v887_v7, %v620_v23  ;;  %s960_s0 = spop %959 }
 0x31b   :  { %v628_v26 = vsel %vm227_vm6, %v627_v25, 0.0 }
 0x31c   :  { %812 = vadd.xlane.f32.xlu0 %v811_v24 }
 0x320   :  { %629 = vadd.xlane.f32.xlu0 %v628_v26 }
 0x348   :  { %s962_s2 = spop %961 }
 0x349   :  { %s249_s29 = smax.f32 %s1093_s28, %s962_s2  ;;  %p248_p1 = scmp.eq.f32.partialorder %s962_s2, 0.0 }
 0x34a   :  { %v250_v27 = vstv %s249_s29 }
 0x34b   :  { %998 = vrcp.f32 %v250_v27 }
 0x358   :  { %v999_v28 = vpop.eup %998 }
 0x359   :  { %963 = vpush %v999_v28 }
 0x38a   :  { %s964_s30 = spop %963 }
 0x38b   :  { %s253_s4 = smul.f32 %s964_s30, %s960_s0 }
 0x38d   :  { %s1196_s4 = smov (%p248_p1, %s253_s4), 0.0 }
 0x38e   :  { %258 = sst [smem:[#allocation8]] %s1196_s4 }
 0x393   :  { %v440_v29 = vpop.xlane.xlu1 %439 }
 0x394   :  { %v441_v31 = vrot.slane %v440_v29, 4 }
 0x396   :  { %v442_v34 = vadd.f32 %v441_v31, %v440_v29 }
 0x397   :  { %v823_v30 = vpop.xlane.xlu1 %822 }
 0x398   :  { %vm824_vm13 = vcmp.ne.f32.partialorder %v823_v30, 0.0  ;;  %v443_v35 = vrot.slane %v442_v34, 2 }
 0x399   :  { %v890_v32 = vsel %vm824_vm13, 1.0, %v1091_v0 }
 0x39a   :  { %v838_v33 = vsel %vm227_vm6, %v890_v32, 0.0  ;;  %v444_v40 = vadd.f32 %v443_v35, %v442_v34 }
 0x39b   :  { %839 = vadd.xlane.f32.xlu1 %v838_v33  ;;  %v640_v54 = vpop.xlane.xlu1 %639 }
 0x39c   :  { %v445_v43 = vrot.slane %v444_v40, 1  ;;  %v641_v56 = vrot.slane %v640_v54, 4 }
 0x39e   :  { %v446_v46 = vadd.f32 %v445_v43, %v444_v40  ;;  %v642_v58 = vadd.f32 %v641_v56, %v640_v54 }
 0x3a0   :  { %v643_v61 = vrot.slane %v642_v58, 2 }
 0x3a1   :  { %v430_v36 = vpop.xlane.xlu0 %429 }
 0x3a2   :  { %v431_v37 = vrot.slane %v430_v36, 4  ;;  %v644_v63 = vadd.f32 %v643_v61, %v642_v58 }
 0x3a4   :  { %v432_v38 = vadd.f32 %v431_v37, %v430_v36  ;;  %v645_v2 = vrot.slane %v644_v63, 1 }
 0x3a5   :  { %v813_v39 = vpop.xlane.xlu0 %812 }
 0x3a6   :  { %v433_v41 = vrot.slane %v432_v38, 2  ;;  %1000 = vrsqrt.f32 %v813_v39  ;;  %vm816_vm14 = vcmp.eq.f32.partialorder %v813_v39, inf  ;;  %v819_v48 = vand.u32 2147483648, %v813_v39 }
 0x3a7   :  { %vm818_vm15 = vcmp.eq.f32.partialorder %v813_v39, 0.0  ;;  %v646_v4 = vadd.f32 %v645_v2, %v644_v63 }
 0x3a8   :  { %v434_v42 = vadd.f32 %v433_v41, %v432_v38 }
 0x3a9   :  { %v630_v53 = vpop.xlane.xlu0 %629 }
 0x3aa   :  { %v435_v44 = vrot.slane %v434_v42, 1  ;;  %v631_v55 = vrot.slane %v630_v53, 4 }
 0x3ac   :  { %v436_v45 = vadd.f32 %v435_v44, %v434_v42  ;;  %v632_v57 = vadd.f32 %v631_v55, %v630_v53 }
 0x3ae   :  { %965 = vpush %v436_v45  ;;  %v633_v60 = vrot.slane %v632_v57, 2 }
 0x3af   :  { %967 = vpush %v446_v46 }
 0x3b0   :  { %v634_v62 = vadd.f32 %v633_v60, %v632_v57 }
 0x3b2   :  { %v635_v1 = vrot.slane %v634_v62, 1 }
 0x3b3   :  { %v1001_v0 = vpop.eup %1000 }
 0x3b4   :  { %v815_v47 = vmul.f32 %v1001_v0, %v813_v39  ;;  %v636_v3 = vadd.f32 %v635_v1, %v634_v62 }
 0x3b6   :  { %v817_v49 = vsel %vm816_vm14, %v813_v39, %v815_v47 }
 0x3b7   :  { %v820_v50 = vsel %vm818_vm15, %v819_v48, %v817_v49 }
 0x3b8   :  { %v827_v51 = vmul.f32 %v890_v32, %v820_v50 }
 0x3ba   :  { %v828_v52 = vsel %vm227_vm6, %v827_v51, 0.0 }
 0x3bb   :  { %829 = vadd.xlane.f32.xlu0 %v828_v52 }
 0x3df   :  { %s966_s5 = spop %965 }
 0x3e0   :  { %s968_s6 = spop %967 }
 0x3e1   :  { %s449_s7 = smax.f32 %s1093_s28, %s968_s6  ;;  %p448_p2 = scmp.eq.f32.partialorder %s968_s6, 0.0 }
 0x3e2   :  { %v450_v59 = vstv %s449_s7 }
 0x3e3   :  { %1002 = vrcp.f32 %v450_v59 }
 0x3f0   :  { %v1003_v5 = vpop.eup %1002 }
 0x3f1   :  { %969 = vpush %v1003_v5 }
 0x3f2   :  { %971 = vpush %v636_v3 }
 0x3f3   :  { %973 = vpush %v646_v4 }
 0x422   :  { %s970_s8 = spop %969 }
 0x423   :  { %s453_s9 = smul.f32 %s970_s8, %s966_s5  ;;  %s972_s10 = spop %971 }
 0x424   :  { %s974_s11 = spop %973  ;;  %v840_v8 = vpop.xlane.xlu1 %839 }
 0x425   :  { %s1198_s9 = smov (%p448_p2, %s453_s9), 0.0  ;;  %s649_s12 = smax.f32 %s1093_s28, %s974_s11  ;;  %v841_v10 = vrot.slane %v840_v8, 4 }
 0x426   :  { %458 = sst [smem:[#allocation8 + $0x80]] %s1198_s9  ;;  %v650_v6 = vstv %s649_s12  ;;  %p648_p3 = scmp.eq.f32.partialorder %s974_s11, 0.0 }
 0x427   :  { %1004 = vrcp.f32 %v650_v6  ;;  %v842_v11 = vadd.f32 %v841_v10, %v840_v8 }
 0x429   :  { %v843_v12 = vrot.slane %v842_v11, 2 }
 0x42b   :  { %v844_v16 = vadd.f32 %v843_v12, %v842_v11 }
 0x42d   :  { %v845_v19 = vrot.slane %v844_v16, 1 }
 0x42f   :  { %v846_v21 = vadd.f32 %v845_v19, %v844_v16 }
 0x434   :  { %v1005_v7 = vpop.eup %1004 }
 0x435   :  { %975 = vpush %v1005_v7 }
 0x444   :  { %v830_v13 = vpop.xlane.xlu0 %829 }
 0x445   :  { %v831_v14 = vrot.slane %v830_v13, 4 }
 0x447   :  { %v832_v15 = vadd.f32 %v831_v14, %v830_v13 }
 0x449   :  { %v833_v17 = vrot.slane %v832_v15, 2 }
 0x44b   :  { %v834_v18 = vadd.f32 %v833_v17, %v832_v15 }
 0x44d   :  { %v835_v20 = vrot.slane %v834_v18, 1 }
 0x44f   :  { %v836_v9 = vadd.f32 %v835_v20, %v834_v18 }
 0x451   :  { %977 = vpush %v836_v9 }
 0x452   :  { %979 = vpush %v846_v21 }
 0x466   :  { %s976_s13 = spop %975 }
 0x467   :  { %s653_s14 = smul.f32 %s976_s13, %s972_s10 }
 0x469   :  { %s1200_s14 = smov (%p648_p3, %s653_s14), 0.0 }
 0x46a   :  { %658 = sst [smem:[#allocation8 + $0x100]] %s1200_s14 }
 0x482   :  { %s978_s15 = spop %977 }
 0x483   :  { %s980_s16 = spop %979 }
 0x484   :  { %s849_s17 = smax.f32 %s1093_s28, %s980_s16  ;;  %p848_p4 = scmp.eq.f32.partialorder %s980_s16, 0.0 }
 0x485   :  { %v850_v22 = vstv %s849_s17 }
 0x486   :  { %1006 = vrcp.f32 %v850_v22 }
 0x493   :  { %v1007_v23 = vpop.eup %1006 }
 0x494   :  { %981 = vpush %v1007_v23 }
 0x4c5   :  { %s982_s21 = spop %981 }
 0x4c6   :  { %s853_s22 = smul.f32 %s982_s21, %s978_s15 }
 0x4c8   :  { %s1202_s22 = smov (%p848_p4, %s853_s22), 0.0 }
 0x4c9   :  { %858 = sst [smem:[#allocation8 + $0x180]] %s1202_s22 }
 0x4ca   :  { %1079 = shalt.err (!%p1076_p9)
}
 0x4cb   :  { %s1094_s24 = smov [#allocation8]  }
 0x4cc   :  { %868 = dma.smem_to_vmem %s1094_s24, 64, %s866_s20, [#allocation4]  }
 0x4cd   :  { %1084 = dma.done.wait [#allocation4], 64  }
 0x4ce   :  { %1085 = vsyncadd [#allocation4], 4294967232 }
 0x4cf   :  { %872 = sfence }
 0x4d0   :  { %873 = vsyncpa [#allocation3], 1 }
 0x4d1   :  { %874 = vsyncpa [#allocation6], 1 }
 0x4d2   :  { %875 = vsyncpa [#allocation4], 1 }

</bundles_post_ra>
